<compile_context>
chip_gen: v6e
topology: v6e:2x2x1
jax: 0.10.0
libtpu: 0.0.40
codegen_flags: <defaults>
</compile_context>

<pallas_src>
import functools

import jax
import jax.numpy as jnp
from jax.experimental import pallas as pl
from jax.experimental.pallas import tpu as pltpu


def _fused_kernel(w_ref, x_ref, o_ref, *, min_value, max_value, cin, cout):
    # w_ref: VMEM (Cout, Cin+1): column j < Cin is weight[j -> all Cout],
    #        column Cin is the bias.  Cout sits on the sublane axis.
    # x_ref: VMEM (1, Cin, P)  -- pixels on the lane axis, P % 128 == 0.
    # o_ref: VMEM (1, Cout, P)
    del cout  # implicit in the shapes
    w = w_ref[...]                                     # (Cout, Cin+1)
    x = x_ref[...]                                     # (1, Cin, P)

    # Dense broadcast-MAC: x channel i (1,1,P) broadcast across the Cout
    # sublanes, weight column i (Cout,1) broadcast across the P lanes; every
    # resulting term is a full (1, Cout, P) tile.
    acc = x[:, 0:1, :] * w[:, 0:1][None, :, :]
    for i in range(1, cin):                            # static unroll, Cin = 3
        acc = acc + x[:, i:i + 1, :] * w[:, i:i + 1][None, :, :]
    acc = acc + w[:, cin:cin + 1][None, :, :]          # + bias

    acc = jnp.maximum(acc, min_value)                  # clamp_min
    acc = jnp.minimum(acc, max_value)                  # clamp_max
    acc = jnp.tanh(acc)                                # tanh
    acc = jnp.tanh(acc)                                # act_4
    o_ref[...] = acc.astype(o_ref.dtype)               # one dense, unmasked store


def make_weight_table(weight_io, bias):
    """Merge ConvTranspose2d weight (Cin, Cout) and bias (Cout,) into one
    (Cout, Cin+1) table (single kernel operand)."""
    return jnp.concatenate(
        [weight_io.T.astype(jnp.float32), bias.astype(jnp.float32)[:, None]], axis=1)


def model_forward(x_nchw, wtab, min_value=-0.3, max_value=-0.1):
    """x_nchw: (N, Cin, H, W) f32; wtab: (Cout, Cin+1) merged weight/bias table."""
    N, Cin, H, W = x_nchw.shape
    Cout = wtab.shape[0]
    if H <= 2 or W <= 2:
        raise ValueError(
            f"ConvTranspose2d(k=1, s=1, p=1) needs H > 2 and W > 2, got H={H}, W={W}")

    # Full image on the lane axis: contiguous reshape, no crop copy before the
    # kernel.  Pad the lane dim to a multiple of 128 if needed (not needed for
    # the 16x16 case: 256 = 2 lane tiles exactly).
    HW = H * W
    P = ((HW + 127) // 128) * 128
    x_flat = x_nchw.reshape(N, Cin, HW)
    if P != HW:
        x_flat = jnp.pad(x_flat, ((0, 0), (0, 0), (0, P - HW)))

    kernel = functools.partial(_fused_kernel, min_value=min_value,
                               max_value=max_value, cin=Cin, cout=Cout)

    out_flat = pl.pallas_call(
        kernel,
        out_shape=jax.ShapeDtypeStruct((N, Cout, P), jnp.float32),
        grid=(N,),
        in_specs=[
            pl.BlockSpec((Cout, Cin + 1), lambda n: (0, 0)),   # merged weight/bias
            pl.BlockSpec((1, Cin, P), lambda n: (n, 0, 0)),    # one image per step
        ],
        out_specs=pl.BlockSpec((1, Cout, P), lambda n: (n, 0, 0)),
        compiler_params=pltpu.CompilerParams(
            dimension_semantics=("parallel",)),                # v7x: 2 TCs split batch
    )(wtab, x_flat)

    # NCHW is a free reshape of the kernel output; the padding=1 border crop is
    # a single small output-side slice.
    out_nchw = out_flat[:, :, :HW].reshape(N, Cout, H, W)
    return out_nchw[:, :, 1:H - 1, 1:W - 1]


def init_params(key, cin=3, cout=8):
    # PyTorch ConvTranspose2d default init: U(-1/sqrt(fan_in), 1/sqrt(fan_in)),
    # fan_in = cin * k * k = cin.  PyTorch weight is (Cin, Cout, 1, 1); we keep (Cin, Cout).
    kw, kb = jax.random.split(key)
    bound = 1.0 / jnp.sqrt(jnp.float32(cin))
    weight = jax.random.uniform(kw, (cin, cout), jnp.float32, -bound, bound)
    bias = jax.random.uniform(kb, (cout,), jnp.float32, -bound, bound)
    return weight, bias


if __name__ == "__main__":
    key = jax.random.PRNGKey(0)
    kx, kp = jax.random.split(key)

    N, Cin, H, W = 2, 3, 16, 16
    Cout = 8
    x = jax.random.normal(kx, (N, Cin, H, W), jnp.float32)
    weight, bias = init_params(kp, Cin, Cout)
    wtab = make_weight_table(weight, bias)

    fwd = jax.jit(model_forward)
    out = jax.block_until_ready(fwd(x, wtab))

    # Pure-JAX reference: 1x1 conv + clamp[-0.3,-0.1] + tanh + tanh, then crop
    # the padding=1 border.
    ref = jnp.einsum("nihw,io->nohw", x, weight) + bias[None, :, None, None]
    ref = jnp.tanh(jnp.tanh(jnp.clip(ref, -0.3, -0.1)))
    ref = ref[:, :, 1:H - 1, 1:W - 1]

    assert out.shape == (N, Cout, H - 2, W - 2), out.shape
    assert jnp.allclose(out, ref, atol=1e-5, rtol=1e-5)

    print("KERNEL_OK")
</pallas_src>

<mosaic_0001>
module attributes {stable_mosaic.version = 11 : i64} {
  func.func @_fused_kernel(%arg0: i32, %arg1: memref<8x4xf32, #tpu.memory_space<vmem>>, %arg2: memref<1x3x256xf32, #tpu.memory_space<vmem>>, %arg3: memref<1x8x256xf32, #tpu.memory_space<vmem>>) attributes {dimension_semantics = [#tpu.dimension_semantics<parallel>], iteration_bounds = array<i64: 2>, scalar_prefetch = 0 : i64, scratch_operands = 0 : i64, tpu.core_type = #tpu.core_type<tc>, window_params = [{pipeline_mode = #tpu.pipeline_mode<synchronous>, transform_indices = @transform_0, window_bounds = array<i64: 8, 4>}, {transform_indices = @transform_1, window_bounds = array<i64: 1, 3, 256>}, {transform_indices = @transform_2, window_bounds = array<i64: 1, 8, 256>}]} {
    %c0 = arith.constant 0 : index
    %c0_0 = arith.constant 0 : index
    %0 = vector.load %arg1[%c0, %c0_0] : memref<8x4xf32, #tpu.memory_space<vmem>>, vector<8x4xf32>
    %c0_1 = arith.constant 0 : index
    %c0_2 = arith.constant 0 : index
    %c0_3 = arith.constant 0 : index
    %1 = vector.load %arg2[%c0_1, %c0_2, %c0_3] : memref<1x3x256xf32, #tpu.memory_space<vmem>>, vector<1x3x256xf32>
    %2 = vector.extract_strided_slice %1 {offsets = [0, 0, 0], sizes = [1, 1, 256], strides = [1, 1, 1]} : vector<1x3x256xf32> to vector<1x1x256xf32>
    %3 = vector.extract_strided_slice %0 {offsets = [0, 0], sizes = [8, 1], strides = [1, 1]} : vector<8x4xf32> to vector<8x1xf32>
    %4 = vector.shape_cast %3 : vector<8x1xf32> to vector<1x8x1xf32>
    %5 = vector.broadcast %2 : vector<1x1x256xf32> to vector<1x8x256xf32>
    %6 = vector.broadcast %4 : vector<1x8x1xf32> to vector<1x8x256xf32>
    %7 = arith.mulf %5, %6 : vector<1x8x256xf32>
    %8 = vector.extract_strided_slice %1 {offsets = [0, 1, 0], sizes = [1, 1, 256], strides = [1, 1, 1]} : vector<1x3x256xf32> to vector<1x1x256xf32>
    %9 = vector.extract_strided_slice %0 {offsets = [0, 1], sizes = [8, 1], strides = [1, 1]} : vector<8x4xf32> to vector<8x1xf32>
    %10 = vector.shape_cast %9 : vector<8x1xf32> to vector<1x8x1xf32>
    %11 = vector.broadcast %8 : vector<1x1x256xf32> to vector<1x8x256xf32>
    %12 = vector.broadcast %10 : vector<1x8x1xf32> to vector<1x8x256xf32>
    %13 = arith.mulf %11, %12 : vector<1x8x256xf32>
    %14 = arith.addf %7, %13 : vector<1x8x256xf32>
    %15 = vector.extract_strided_slice %1 {offsets = [0, 2, 0], sizes = [1, 1, 256], strides = [1, 1, 1]} : vector<1x3x256xf32> to vector<1x1x256xf32>
    %16 = vector.extract_strided_slice %0 {offsets = [0, 2], sizes = [8, 1], strides = [1, 1]} : vector<8x4xf32> to vector<8x1xf32>
    %17 = vector.shape_cast %16 : vector<8x1xf32> to vector<1x8x1xf32>
    %18 = vector.broadcast %15 : vector<1x1x256xf32> to vector<1x8x256xf32>
    %19 = vector.broadcast %17 : vector<1x8x1xf32> to vector<1x8x256xf32>
    %20 = arith.mulf %18, %19 : vector<1x8x256xf32>
    %21 = arith.addf %14, %20 : vector<1x8x256xf32>
    %22 = vector.extract_strided_slice %0 {offsets = [0, 3], sizes = [8, 1], strides = [1, 1]} : vector<8x4xf32> to vector<8x1xf32>
    %23 = vector.shape_cast %22 : vector<8x1xf32> to vector<1x8x1xf32>
    %24 = vector.broadcast %23 : vector<1x8x1xf32> to vector<1x8x256xf32>
    %25 = arith.addf %21, %24 : vector<1x8x256xf32>
    %cst = arith.constant -3.000000e-01 : f32
    %26 = vector.broadcast %cst : f32 to vector<1x8x256xf32>
    %27 = arith.maximumf %25, %26 : vector<1x8x256xf32>
    %cst_4 = arith.constant -1.000000e-01 : f32
    %28 = vector.broadcast %cst_4 : f32 to vector<1x8x256xf32>
    %29 = arith.minimumf %27, %28 : vector<1x8x256xf32>
    %30 = math.tanh %29 : vector<1x8x256xf32>
    %31 = math.tanh %30 : vector<1x8x256xf32>
    %c0_5 = arith.constant 0 : index
    %c0_6 = arith.constant 0 : index
    %c0_7 = arith.constant 0 : index
    %32 = vector.load %arg3[%c0_5, %c0_6, %c0_7] : memref<1x8x256xf32, #tpu.memory_space<vmem>>, vector<1x8x256xf32>
    tpu.vector_store %arg3[%c0_5, %c0_6, %c0_7], %31 {strides = array<i32>} : memref<1x8x256xf32, #tpu.memory_space<vmem>>, vector<1x8x256xf32>,
    return
  }
  func.func @transform_0(%arg0: i32) -> (i32, i32) {
    %c0_i32 = arith.constant 0 : i32
    %c0_i32_0 = arith.constant 0 : i32
    %c0_i32_1 = arith.constant 0 : i32
    return %c0_i32, %c0_i32_0 : i32, i32
  }
  func.func @transform_1(%arg0: i32) -> (i32, i32, i32) {
    %c0_i32 = arith.constant 0 : i32
    %c0_i32_0 = arith.constant 0 : i32
    %c0_i32_1 = arith.constant 0 : i32
    return %arg0, %c0_i32, %c0_i32_0 : i32, i32, i32
  }
  func.func @transform_2(%arg0: i32) -> (i32, i32, i32) {
    %c0_i32 = arith.constant 0 : i32
    %c0_i32_0 = arith.constant 0 : i32
    %c0_i32_1 = arith.constant 0 : i32
    return %arg0, %c0_i32, %c0_i32_0 : i32, i32, i32
  }
}

</mosaic_0001>

<bundles_post_ra>
// kernel: model_forward.1
= control target key start
LH: loop header
LB: loop body
LE: loop exit
PB: predicated region body
PF: predicated region fallthrough
CT: control target
= control target key end

     0   :  { %s360_s9 = smov 0   ;;  %s384_s0 = inlined_call_operand.vmem [shape: f32[8,4], index: 0, kind: input, shape index: {}]   ;;  %s385_s1 = inlined_call_operand.vmem [shape: f32[2,3,256], index: 1, kind: input, shape index: {}]   ;;  %s386_s2 = inlined_call_operand.vmem [shape: f32[2,8,256], index: 2, kind: output, shape index: {}]  }
   0x1 LB: > { %s295_s10 = sadd.s32 4294967295, %s339_s9   ;;  %p299_p0 = scmp.ge.s32.totalorder %s339_s9, 1  ;;  %s339_s9 = sphi %s360_s9, %s12_s9  }
   0x2   : > { %p112_p1 = scmp.lt.s32.totalorder %s339_s9, 3 }
   0x4   : > { %p113_p2 = pnand %p299_p0, %p112_p1 }
   0x5   : > { %p134_p3 = scmp.lt.s32.totalorder (!%p113_p2), %s295_s10, 1 }
   0x6   : > { %116 = sbr.rel (%p113_p2) target bundleno = 184 (0xb8), region = 28 }
   0xb   : > { %v144_v0 = vld [vmem:[%s384_s0] sm:$0xff]  ;;  %v341_v1 = vmov 0   ;;  %v342_v2 = vmov 2   ;;  %v343_v3 = vmov 1   ;;  %v344_v4 = vmov 3   ;;  %s388_s10 = smov (!%p134_p3, %s295_s10), 1 }
   0xc   : > { %320 = vset.pattern.permute.xlu0 %v341_v1  ;;  %322 = vset.pattern.permute.xlu1 %v342_v2  ;;  %v147_v5 = vlaneseq  ;;  %s306_s13 = sshll.u32 %s388_s10, 3  ;;  %s307_s17 = sshll.u32 %s388_s10, 4 }
   0xd   : > { %167 = vperm.xlu0 %320, %v144_v0   ;;  %217 = vperm.xlu1 %322, %v144_v0   ;;  %s138_s16 = scalar_lea.vmem %s385_s1, %s306_s13  ;;  %s143_s20 = scalar_lea.vmem %s386_s2, %s307_s17 }
   0xe   : > { %v148_v6 = vshrl.u32 %v147_v5, 7  ;;  %v145_v9 = vld [vmem:[%s138_s16] sm:$0x77] }
  0x10   : > { %v149_v7 = vsub.s32 0, %v148_v6  ;;  %v153_v8 = vsub.s32 4, %v148_v6  ;;  %v174_v10 = vsub.s32 1, %v148_v6  ;;  %v178_v11 = vsub.s32 5, %v148_v6 }
  0x11   : > { %321 = vset.pattern.permute.xlu0 %v343_v3  ;;  %323 = vset.pattern.permute.xlu1 %v344_v4  ;;  %v200_v12 = vsub.s32 2, %v148_v6  ;;  %v204_v13 = vsub.s32 6, %v148_v6 }
  0x12   : > { %191 = vperm.xlu0 %321, %v144_v0   ;;  %225 = vperm.xlu1 %323, %v144_v0   ;;  %v150_v14 = vrot.slane %v145_v9, %v149_v7  ;;  %v154_v15 = vrot.slane %v145_v9, %v153_v8  ;;  %v175_v16 = vrot.slane %v145_v9, %v174_v10 }
  0x13   : > { %v179_v17 = vrot.slane %v145_v9, %v178_v11  ;;  %v201_v18 = vrot.slane %v145_v9, %v200_v12  ;;  %v205_v19 = vrot.slane %v145_v9, %v204_v13 }
  0x14   : > { %v160_v21 = vrot.slane %v150_v14, %v149_v7  ;;  %v164_v22 = vrot.slane %v154_v15, %v149_v7  ;;  %v185_v23 = vrot.slane %v175_v16, %v174_v10 }
  0x15   : > { %v189_v24 = vrot.slane %v179_v17, %v174_v10  ;;  %v211_v25 = vrot.slane %v201_v18, %v200_v12  ;;  %v215_v26 = vrot.slane %v205_v19, %v200_v12 }
  0x16   : > { %324 = vset.pattern.permute.xlu0 %v344_v4 }
  0x88   : > { %v168_v20 = vpop.permute.xlu0 %167  ;;  %v218_v27 = vpop.permute.xlu1 %217 }
  0x89   : > { %v170_v28 = vmul.f32 %v168_v20, %v160_v21  ;;  %v171_v29 = vmul.f32 %v168_v20, %v164_v22  ;;  %v220_v33 = vmul.f32 %v218_v27, %v211_v25  ;;  %v221_v34 = vmul.f32 %v218_v27, %v215_v26 }
  0x8d   : > { %v192_v30 = vpop.permute.xlu0 %191  ;;  %v226_v37 = vpop.permute.xlu1 %225 }
  0x8e   : > { %v194_v31 = vmul.f32 %v192_v30, %v185_v23  ;;  %v195_v32 = vmul.f32 %v192_v30, %v189_v24 }
  0x90   : > { %v196_v35 = vadd.f32 %v194_v31, %v170_v28  ;;  %v197_v36 = vadd.f32 %v195_v32, %v171_v29 }
  0x92   : > { %v222_v38 = vadd.f32 %v220_v33, %v196_v35  ;;  %v223_v39 = vadd.f32 %v221_v34, %v197_v36 }
  0x94   : > { %v228_v40 = vadd.f32 %v226_v37, %v222_v38  ;;  %v229_v41 = vadd.f32 %v226_v37, %v223_v39 }
  0x96   : > { %v230_v42 = vmax.f32 %v228_v40, -0.3  ;;  %v231_v43 = vmax.f32 %v229_v41, -0.3 }
  0x98   : > { %v232_v44 = vmin.f32 %v230_v42, -0.1  ;;  %v233_v45 = vmin.f32 %v231_v43, -0.1 }
  0x9a   : > { %325 = vtanh.f32 %v232_v44 }
  0x9b   : > { %327 = vtanh.f32 %v233_v45 }
  0xa7   : > { %v326_v46 = vpop.eup %325 }
  0xa8   : > { %v328_v47 = vpop.eup %327  ;;  %329 = vtanh.f32 %v326_v46 }
  0xa9   : > { %331 = vtanh.f32 %v328_v47 }
  0xb5   : > { %v330_v48 = vpop.eup %329 }
  0xb6   : > { %v332_v49 = vpop.eup %331  ;;  %238 = vst [vmem:[%s143_s20] sm:$0xff] %v330_v48 }
  0xb7   : > { %239 = vst [vmem:[%s143_s20 + $0x8] sm:$0xff] %v332_v49 }
  0xb8 PF: > { %s12_s9 = sadd.s32 1, %s339_s9  }
  0xb9   : > { %p9_p4 = scmp.ge.s32.totalorder %s12_s9, 4  }
  0xbb   :  { %11 = sbr.rel (!%p9_p4) target bundleno = 1 (0x1), region = 58 }

</bundles_post_ra>
